<compile_context>
chip_gen: v6e
topology: v6e:2x2x1
jax: 0.10.0
libtpu: 0.0.40
codegen_flags: <defaults>
</compile_context>

<pallas_src>
import functools

import jax
import jax.numpy as jnp
from jax import lax
from jax.experimental import pallas as pl
from jax.experimental.pallas import tpu as pltpu


def _cam_kernel(gamma_ref, x_ref, o_ref, energy_ref, attn_ref, *,
                n_tiles, tile_n, n_valid_last):
    """grid = (batch, 2 * n_tiles).

    gamma_ref : SMEM (1,) f32 scalar.
    x_ref     : VMEM (C, tile_n) input tile of the current image.
    o_ref     : VMEM (C, tile_n) output tile.
    energy_ref: VMEM (C, C) f32 scratch  (energy accumulator, persists over n).
    attn_ref  : VMEM (C, C) bf16 scratch (softmax attention weights).
    """
    step = pl.program_id(1)

    # ---------------- phase 1: accumulate energy over the N tiles -----------
    @pl.when(step == 0)
    def _init():
        energy_ref[...] = jnp.zeros_like(energy_ref)

    @pl.when(step < n_tiles)
    def _phase1():
        xt = x_ref[...]                                     # (C, tile_n)
        if n_valid_last != tile_n:
            # Ragged last tile: lanes >= n_valid_last hold whatever the
            # partial DMA left behind; zero them so they add 0 to the energy.
            lane = lax.broadcasted_iota(jnp.int32, xt.shape, 1)
            limit = jnp.where(step == n_tiles - 1, n_valid_last, tile_n)
            xt = jnp.where(lane < limit, xt, jnp.zeros_like(xt))
        xb = xt.astype(jnp.bfloat16)
        # energy += x_tile @ x_tile^T : contract the lane (N) axis of both
        # operands so no transposed copy of the tile is materialized.
        # TODO(synk): confirm on v5e (bundle dump) that this contraction does
        # not emit an XLU vxpose of the tile; if it does, pre-stage a
        # transposed tile instead.
        energy_ref[...] += lax.dot_general(
            xb, xb,
            dimension_numbers=(((1,), (1,)), ((), ())),
            preferred_element_type=jnp.float32)

    # ------- phase boundary: one softmax over the accumulated (C, C) --------
    # softmax(rowmax(E) - E) == softmax(-E); the stable single-reduction form
    # is exp(rowmin(E) - E) / sum(...).  Only the persistent energy (f32) and
    # attention (bf16) CxC buffers survive this step.
    @pl.when(step == n_tiles)
    def _softmax():
        e = energy_ref[...]
        p = jnp.exp(jnp.min(e, axis=-1, keepdims=True) - e)
        denom = jnp.sum(p, axis=-1, keepdims=True)
        # EUP reciprocal (approx) instead of a VPU divide; rows sum to 1
        # within ~2^-12 relative error (use approx=False for exact rows).
        attn_ref[...] = (p * pl.reciprocal(denom, approx=True)
                         ).astype(attn_ref.dtype)

    # ------------- phase 2: out_tile = gamma*(attn @ x_tile) + x_tile -------
    @pl.when(step >= n_tiles)
    def _phase2():
        xt = x_ref[...]
        out = lax.dot_general(
            attn_ref[...], xt.astype(jnp.bfloat16),
            dimension_numbers=(((1,), (0,)), ((), ())),
            preferred_element_type=jnp.float32)             # (C, tile_n)
        # The f32 cast of x happens only here (residual); it never lives
        # across the matmuls.  Out-of-bounds lanes of a ragged last tile are
        # dropped by the bounded write-back DMA.
        o_ref[...] = (gamma_ref[0] * out
                      + xt.astype(jnp.float32)).astype(o_ref.dtype)


def _vmem_budget_bytes():
    """~80% of physical VMEM per core (v5e/v6e: 128 MiB, v7x: 64 MiB)."""
    try:
        cap = int(pltpu.get_tpu_info().vmem_capacity_bytes)
    except Exception:
        cap = 64 * 1024 * 1024            # conservative (v7x) fallback
    return int(0.8 * cap)


def _pick_n_tile(N, C, itemsize, budget):
    """Largest lane tile whose per-step footprint fits the VMEM budget.

    A single whole-N tile is preferred when it fits (x then streams through
    VMEM exactly once per image — the block index does not change between the
    two phases, so no re-fetch).  Otherwise the largest multiple of 256
    (MXU width on v6e/v7x; 128 only as a last resort) that fits.
    """
    def need(tn):
        return (4 * C * tn * itemsize     # double-buffered in + out blocks
                + 12 * C * tn             # bf16/f32 working copies of the tile
                + 6 * C * C               # energy (f32) + attention (bf16)
                + (2 << 20))              # headroom
    if need(N) <= budget:
        return N
    for tn in (4096, 2048, 1024, 512, 256, 128):
        if tn < N and need(tn) <= budget:
            return tn
    # TODO(synk): very large C (the C*C scratch alone over budget) would need
    # an additional C-tiling of the energy/attention matrices.
    return 128


@functools.partial(jax.jit, static_argnames=("tile_n",))
def cam_module_forward(x, gamma, tile_n=None):
    """x: (B, C, H, W), gamma: (1,) -> (B, C, H, W). Mirrors CAM_Module.forward."""
    B, C, H, W = x.shape
    N = H * W
    itemsize = jnp.dtype(x.dtype).itemsize
    budget = _vmem_budget_bytes()

    tn = tile_n if tile_n is not None else _pick_n_tile(N, C, itemsize, budget)
    tn = min(tn, N)
    n_tiles = pl.cdiv(N, tn)
    n_valid_last = N - (n_tiles - 1) * tn

    x_flat = x.reshape(B, C, N)           # pure reshape — no pad, no slice
    gamma = jnp.asarray(gamma, jnp.float32).reshape(1)

    # x block index: phase 1 walks tiles 0..n_tiles-1, phase 2 walks them again.
    def x_index(b, n):
        return (b, 0, jnp.where(n < n_tiles, n, n - n_tiles))

    # out block index: parked on tile 0 during phase 1 (the kernel does not
    # write it there, and no write-back happens until the index changes after
    # the first phase-2 step, which produces tile 0).
    def o_index(b, n):
        return (b, 0, jnp.maximum(n - n_tiles, 0))

    kernel = functools.partial(_cam_kernel, n_tiles=n_tiles, tile_n=tn,
                               n_valid_last=n_valid_last)

    cost = pl.CostEstimate(
        flops=4 * B * C * C * N,                      # two bmm's, 2 flop/MAC
        transcendentals=B * C * C,                    # exp
        bytes_accessed=3 * B * C * N * itemsize + B * C * C * 4)

    # Note: for very small C the pipeline is DMA/overhead-bound; a deeper
    # x-input pipeline (pipeline_mode=pl.Buffered(3)) is a further knob.
    out_flat = pl.pallas_call(
        kernel,
        out_shape=jax.ShapeDtypeStruct((B, C, N), x.dtype),
        grid_spec=pltpu.PrefetchScalarGridSpec(
            num_scalar_prefetch=0,
            grid=(B, 2 * n_tiles),
            in_specs=[
                pl.BlockSpec(memory_space=pltpu.MemorySpace.SMEM),   # gamma
                pl.BlockSpec((None, C, tn), x_index),                # x tiles
            ],
            out_specs=pl.BlockSpec((None, C, tn), o_index),
            scratch_shapes=[
                pltpu.VMEM((C, C), jnp.float32),      # energy accumulator
                pltpu.VMEM((C, C), jnp.bfloat16),     # attention weights
            ]),
        compiler_params=pltpu.CompilerParams(
            dimension_semantics=("parallel", "arbitrary"),
            vmem_limit_bytes=budget),
        cost_estimate=cost,
    )(gamma, x_flat)

    return out_flat.reshape(B, C, H, W)


def cam_reference_f32(x, gamma):
    """Pure-JAX f32 reference mirroring the PyTorch forward."""
    B, C, H, W = x.shape
    xf = x.reshape(B, C, H * W).astype(jnp.float32)
    energy = jnp.einsum("bcn,bdn->bcd", xf, xf, precision=lax.Precision.HIGHEST)
    e_new = jnp.max(energy, axis=-1, keepdims=True) - energy
    attn = jax.nn.softmax(e_new, axis=-1)
    out = jnp.einsum("bcd,bdn->bcn", attn, xf,
                     precision=lax.Precision.HIGHEST).reshape(B, C, H, W)
    return gamma[0] * out + x


def cam_reference_bf16(x, gamma):
    """Reference with the kernel's bf16-MXU / f32-accumulate numerics."""
    B, C, H, W = x.shape
    xf = x.reshape(B, C, H * W)
    xb = xf.astype(jnp.bfloat16)
    energy = jnp.einsum("bcn,bdn->bcd", xb, xb, preferred_element_type=jnp.float32)
    p = jnp.exp(jnp.min(energy, axis=-1, keepdims=True) - energy)
    attn = p / jnp.sum(p, axis=-1, keepdims=True)
    out = jnp.einsum("bcd,bdn->bcn", attn.astype(jnp.bfloat16), xb,
                     preferred_element_type=jnp.float32)
    out = out.reshape(B, C, H, W).astype(jnp.float32)
    return gamma[0] * out + x.astype(jnp.float32)


if __name__ == "__main__":
    key = jax.random.PRNGKey(0)
    B, C, H, W = 2, 4, 16, 16
    x = jax.random.normal(key, (B, C, H, W), dtype=jnp.float32)

    # 1) gamma = 0 (the module's nn.Parameter(torch.zeros(1)) init): out == x.
    gamma0 = jnp.zeros((1,), dtype=jnp.float32)
    out0 = jax.block_until_ready(cam_module_forward(x, gamma0))
    assert out0.shape == (B, C, H, W)
    assert jnp.allclose(out0, x, atol=1e-6), "gamma=0 (init) path mismatch"

    # 2) non-zero gamma, default tile (single whole-N tile at this size).
    gamma1 = jnp.full((1,), 0.5, dtype=jnp.float32)
    out1 = jax.block_until_ready(cam_module_forward(x, gamma1))
    ref_b = cam_reference_bf16(x, gamma1)
    ref_f = cam_reference_f32(x, gamma1)
    # Tight check vs a reference with matching bf16-MXU numerics.
    assert jnp.allclose(out1, ref_b, atol=2e-2, rtol=2e-2), "bf16-matched mismatch"
    # Loose check vs the full-f32 PyTorch-equivalent reference (kernel uses
    # bf16 MXU inputs, so tolerance is relaxed accordingly).
    assert jnp.allclose(out1, ref_f, atol=2e-1, rtol=2e-1), "f32 reference mismatch"

    # 3) force the multi-tile two-phase path (N=256 -> two aligned 128 tiles).
    out_t = jax.block_until_ready(cam_module_forward(x, gamma1, tile_n=128))
    assert jnp.allclose(out_t, ref_b, atol=2e-2, rtol=2e-2), "tiled path mismatch"

    # 4) ragged spatial size (N = 20*15 = 300) with forced 128 tiles:
    #    exercises the masked last tile and bounded output write-back.
    x2 = jax.random.normal(jax.random.PRNGKey(1), (2, 4, 20, 15), dtype=jnp.float32)
    out2 = jax.block_until_ready(cam_module_forward(x2, gamma1, tile_n=128))
    ref2_b = cam_reference_bf16(x2, gamma1)
    ref2_f = cam_reference_f32(x2, gamma1)
    assert jnp.allclose(out2, ref2_b, atol=2e-2, rtol=2e-2), "ragged bf16 mismatch"
    assert jnp.allclose(out2, ref2_f, atol=2e-1, rtol=2e-1), "ragged f32 mismatch"

    print("KERNEL_OK")
</pallas_src>

<mosaic_0001>
module attributes {stable_mosaic.version = 11 : i64} {
  func.func @_cam_kernel(%arg0: i32, %arg1: i32, %arg2: memref<1xf32, #tpu.memory_space<smem>>, %arg3: memref<1x4x256xf32, #tpu.memory_space<vmem>>, %arg4: memref<1x4x256xf32, #tpu.memory_space<vmem>>, %arg5: memref<4x4xf32, #tpu.memory_space<vmem>>, %arg6: memref<4x4xbf16, #tpu.memory_space<vmem>>) attributes {dimension_semantics = [#tpu.dimension_semantics<parallel>, #tpu.dimension_semantics<arbitrary>], iteration_bounds = array<i64: 2, 2>, scalar_prefetch = 0 : i64, scratch_operands = 2 : i64, tpu.core_type = #tpu.core_type<tc>, window_params = [{transform_indices = @transform_0, window_bounds = array<i64: 1>}, {transform_indices = @transform_1, window_bounds = array<i64: 1, 4, 256>}, {transform_indices = @transform_2, window_bounds = array<i64: 1, 4, 256>}]} {
    %c0_i32 = arith.constant 0 : i32
    %0 = arith.cmpi eq, %arg1, %c0_i32 : i32
    %1 = arith.extui %0 : i1 to i32
    %c0_i32_0 = arith.constant 0 : i32
    %2 = arith.cmpi ne, %1, %c0_i32_0 : i32
    scf.if %2 {
      %cst = arith.constant 0.000000e+00 : f32
      %12 = vector.broadcast %cst : f32 to vector<4x4xf32>
      %c0 = arith.constant 0 : index
      %c0_6 = arith.constant 0 : index
      %13 = vector.load %arg5[%c0, %c0_6] : memref<4x4xf32, #tpu.memory_space<vmem>>, vector<4x4xf32>
      tpu.vector_store %arg5[%c0, %c0_6], %12 {strides = array<i32>} : memref<4x4xf32, #tpu.memory_space<vmem>>, vector<4x4xf32>,
    } else {
    }
    %c1_i32 = arith.constant 1 : i32
    %3 = arith.cmpi slt, %arg1, %c1_i32 : i32
    %4 = arith.extui %3 : i1 to i32
    %c0_i32_1 = arith.constant 0 : i32
    %5 = arith.cmpi ne, %4, %c0_i32_1 : i32
    scf.if %5 {
      %c0 = arith.constant 0 : index
      %c0_6 = arith.constant 0 : index
      %c0_7 = arith.constant 0 : index
      %12 = vector.load %arg3[%c0, %c0_6, %c0_7] : memref<1x4x256xf32, #tpu.memory_space<vmem>>, vector<1x4x256xf32>
      %13 = vector.shape_cast %12 : vector<1x4x256xf32> to vector<4x256xf32>
      %14 = arith.truncf %13 : vector<4x256xf32> to vector<4x256xbf16>
      %c0_8 = arith.constant 0 : index
      %c0_9 = arith.constant 0 : index
      %15 = vector.load %arg5[%c0_8, %c0_9] : memref<4x4xf32, #tpu.memory_space<vmem>>, vector<4x4xf32>
      %cst = arith.constant dense<0.000000e+00> : vector<4x4xf32>
      %16 = tpu.matmul %14, %14, %cst {dimension_numbers = #tpu.dot_dimension_numbers<[1], [1], [0], [0], [0, 0, 1, 0], [], []>} : vector<4x256xbf16>, vector<4x256xbf16>, vector<4x4xf32> -> vector<4x4xf32>
      %17 = arith.addf %15, %16 : vector<4x4xf32>
      %c0_10 = arith.constant 0 : index
      %c0_11 = arith.constant 0 : index
      %18 = vector.load %arg5[%c0_10, %c0_11] : memref<4x4xf32, #tpu.memory_space<vmem>>, vector<4x4xf32>
      tpu.vector_store %arg5[%c0_10, %c0_11], %17 {strides = array<i32>} : memref<4x4xf32, #tpu.memory_space<vmem>>, vector<4x4xf32>,
    } else {
    }
    %c1_i32_2 = arith.constant 1 : i32
    %6 = arith.cmpi eq, %arg1, %c1_i32_2 : i32
    %7 = arith.extui %6 : i1 to i32
    %c0_i32_3 = arith.constant 0 : i32
    %8 = arith.cmpi ne, %7, %c0_i32_3 : i32
    scf.if %8 {
      %c0 = arith.constant 0 : index
      %c0_6 = arith.constant 0 : index
      %12 = vector.load %arg5[%c0, %c0_6] : memref<4x4xf32, #tpu.memory_space<vmem>>, vector<4x4xf32>
      %cst = arith.constant dense<0x7F800000> : vector<4xf32>
      %13 = vector.multi_reduction <minimumf>, %12, %cst [1] : vector<4x4xf32> to vector<4xf32>
      %14 = vector.shape_cast %13 : vector<4xf32> to vector<4x1xf32>
      %15 = vector.broadcast %14 : vector<4x1xf32> to vector<4x4xf32>
      %16 = arith.subf %15, %12 : vector<4x4xf32>
      %17 = math.exp %16 : vector<4x4xf32>
      %cst_7 = arith.constant dense<0.000000e+00> : vector<4xf32>
      %18 = vector.multi_reduction <add>, %17, %cst_7 [1] : vector<4x4xf32> to vector<4xf32>
      %19 = vector.shape_cast %18 : vector<4xf32> to vector<4x1xf32>
      %20 = tpu.reciprocal %19 {approx = true} : vector<4x1xf32> -> vector<4x1xf32>
      %21 = vector.broadcast %20 : vector<4x1xf32> to vector<4x4xf32>
      %22 = arith.mulf %17, %21 : vector<4x4xf32>
      %23 = arith.truncf %22 : vector<4x4xf32> to vector<4x4xbf16>
      %c0_8 = arith.constant 0 : index
      %c0_9 = arith.constant 0 : index
      %24 = vector.load %arg6[%c0_8, %c0_9] : memref<4x4xbf16, #tpu.memory_space<vmem>>, vector<4x4xbf16>
      tpu.vector_store %arg6[%c0_8, %c0_9], %23 {strides = array<i32>} : memref<4x4xbf16, #tpu.memory_space<vmem>>, vector<4x4xbf16>,
    } else {
    }
    %c1_i32_4 = arith.constant 1 : i32
    %9 = arith.cmpi sge, %arg1, %c1_i32_4 : i32
    %10 = arith.extui %9 : i1 to i32
    %c0_i32_5 = arith.constant 0 : i32
    %11 = arith.cmpi ne, %10, %c0_i32_5 : i32
    scf.if %11 {
      %c0 = arith.constant 0 : index
      %c0_6 = arith.constant 0 : index
      %c0_7 = arith.constant 0 : index
      %12 = vector.load %arg3[%c0, %c0_6, %c0_7] : memref<1x4x256xf32, #tpu.memory_space<vmem>>, vector<1x4x256xf32>
      %13 = vector.shape_cast %12 : vector<1x4x256xf32> to vector<4x256xf32>
      %c0_8 = arith.constant 0 : index
      %c0_9 = arith.constant 0 : index
      %14 = vector.load %arg6[%c0_8, %c0_9] : memref<4x4xbf16, #tpu.memory_space<vmem>>, vector<4x4xbf16>
      %15 = arith.truncf %13 : vector<4x256xf32> to vector<4x256xbf16>
      %cst = arith.constant dense<0.000000e+00> : vector<4x256xf32>
      %16 = tpu.matmul %14, %15, %cst {dimension_numbers = #tpu.dot_dimension_numbers<[1], [0], [0], [1], [0, 0, 1, 1], [], []>} : vector<4x4xbf16>, vector<4x256xbf16>, vector<4x256xf32> -> vector<4x256xf32>
      %c0_10 = arith.constant 0 : index
      %17 = memref.load %arg2[%c0_10] : memref<1xf32, #tpu.memory_space<smem>>
      %18 = vector.broadcast %17 : f32 to vector<4x256xf32>
      %19 = arith.mulf %18, %16 : vector<4x256xf32>
      %20 = arith.addf %19, %13 : vector<4x256xf32>
      %c0_11 = arith.constant 0 : index
      %c0_12 = arith.constant 0 : index
      %c0_13 = arith.constant 0 : index
      %21 = vector.load %arg4[%c0_11, %c0_12, %c0_13] : memref<1x4x256xf32, #tpu.memory_space<vmem>>, vector<1x4x256xf32>
      %22 = vector.shape_cast %21 : vector<1x4x256xf32> to vector<4x256xf32>
      %23 = vector.shape_cast %20 : vector<4x256xf32> to vector<1x4x256xf32>
      tpu.vector_store %arg4[%c0_11, %c0_12, %c0_13], %23 {strides = array<i32>} : memref<1x4x256xf32, #tpu.memory_space<vmem>>, vector<1x4x256xf32>,
    } else {
    }
    return
  }
  func.func @transform_0(%arg0: i32, %arg1: i32) -> i32 {
    %c0_i32 = arith.constant 0 : i32
    %c0_i32_0 = arith.constant 0 : i32
    return %c0_i32 : i32
  }
  func.func @transform_1(%arg0: i32, %arg1: i32) -> (i32, i32, i32) {
    %c1_i32 = arith.constant 1 : i32
    %0 = arith.cmpi slt, %arg1, %c1_i32 : i32
    %c1_i32_0 = arith.constant 1 : i32
    %1 = arith.subi %arg1, %c1_i32_0 : i32
    %2 = arith.select %0, %arg1, %1 : i32
    %c0_i32 = arith.constant 0 : i32
    %c0_i32_1 = arith.constant 0 : i32
    return %arg0, %c0_i32, %2 : i32, i32, i32
  }
  func.func @transform_2(%arg0: i32, %arg1: i32) -> (i32, i32, i32) {
    %c1_i32 = arith.constant 1 : i32
    %0 = arith.subi %arg1, %c1_i32 : i32
    %c0_i32 = arith.constant 0 : i32
    %1 = arith.maxsi %0, %c0_i32 : i32
    %c0_i32_0 = arith.constant 0 : i32
    %c0_i32_1 = arith.constant 0 : i32
    return %arg0, %c0_i32_0, %1 : i32, i32, i32
  }
}

</mosaic_0001>

<bundles_post_ra>
// kernel: cam_module_forward.1
= control target key start
LH: loop header
LB: loop body
LE: loop exit
PB: predicated region body
PF: predicated region fallthrough
CT: control target
= control target key end

     0   :  { %s607_s11 = smov 0   ;;  %s609_s12 = smov 0   ;;  %s677_s0 = inlined_call_operand.<no memory space> [shape: f32[1], index: 0, kind: input, shape index: {}]   ;;  %s678_s1 = inlined_call_operand.vmem [shape: f32[2,4,256], index: 1, kind: input, shape index: {}]   ;;  %s679_s2 = inlined_call_operand.vmem [shape: f32[2,4,256], index: 2, kind: output, shape index: {}]  }
   0x1   :  { %7 = sst [smem:[#allocation4]] %s677_s0  ;;  %s611_s13 = smov 0  }
   0x2   :  { %s613_s14 = smov 0   ;;  %s615_s15 = smov 0  }
   0x3 LB: > { %s22_s0 = sadd.s32 1, %s577_s13  ;;  %s25_s16 = sadd.s32 1, %s581_s14  ;;  %s585_s15 = sphi %s615_s15, %s13_s15   ;;  %s581_s14 = sphi %s613_s14, %s683_s14   ;;  %s577_s13 = sphi %s611_s13, %s682_s13   ;;  %s573_s12 = sphi %s609_s12, %s681_s12   ;;  %s569_s11 = sphi %s607_s11, %s680_s11  }
   0x4   : > { %p23_p0 = scmp.ge.s32.totalorder %s22_s0, 2  ;;  %p482_p1 = scmp.ge.s32.totalorder %s585_s15, 1 }
   0x5   : > { %p152_p2 = scmp.lt.s32.totalorder %s585_s15, 5 }
   0x6   : > { %s685_s0 = smov (%p23_p0, %s22_s0), 0  ;;  %s687_s16 = smov (!%p23_p0, %s25_s16), %s581_s14 }
   0x7   : > { %p153_p3 = pnand %p482_p1, %p152_p2  ;;  %p27_p4 = scmp.ge.s32.totalorder %s687_s16, 2 }
   0x8   : > { %p188_p5 = scmp.lt.s32.totalorder (!%p153_p3), %s569_s11, 1  ;;  %s483_s17 = sadd.s32 (!%p153_p3), 4294967295, %s569_s11 }
   0x9   : > { %s689_s16 = smov (%p27_p4, %s687_s16), 0  ;;  %156 = sbr.rel (%p153_p3) target bundleno = 784 (0x310), region = 28 }
   0xa   : > { %p192_p6 = scmp.lt.s32.totalorder (!%p153_p3), %s573_s12, 1  ;;  %p205_p7 = scmp.gt.s32.totalorder (!%p153_p3), %s483_s17, 0 }
   0xb   : > { %p491_p10 = scmp.ne.s32.totalorder (!%p153_p3), %s569_s11, 0 }
   0xe   : > { %s190_s18 = scalar_select %p188_p5, %s569_s11, %s483_s17 }
   0xf   : > { %s691_s12 = smov (!%p192_p6, %s573_s12), 1  ;;  %s693_s17 = smov (!%p205_p7, %s483_s17), 0 }
  0x10   : > { %s484_s19 = sshll.u32 %s190_s18, 1  ;;  %s485_s20 = sshll.u32 %s691_s12, 1 }
  0x11   : > { %p194_p8 = scmp.lt.s32.totalorder %s484_s19, 1  ;;  %s488_s21 = sshll.u32 %s693_s17, 1 }
  0x12   : > { %p210_p9 = scmp.lt.s32.totalorder %s488_s21, 1 }
  0x13   : > { %s695_s19 = smov (!%p194_p8, %s484_s19), 1  ;;  %224 = sbr.rel (%p491_p10) target bundleno = 26 (0x1a), region = 32 }
  0x14   : > { %s197_s22 = sadd.s32 %s485_s20, %s695_s19  ;;  %s697_s21 = smov (!%p210_p9, %s488_s21), 1 }
  0x15   : > { %s486_s23 = sshll.u32 %s197_s22, 2  ;;  %s213_s27 = sadd.s32 %s485_s20, %s697_s21 }
  0x16   : > { %s647_s26 = scalar_lea.vmem %s678_s1, %s486_s23  ;;  %s490_s28 = sshll.u32 %s213_s27, 2 }
  0x17   : > { %s652_s3 = scalar_lea.vmem %s679_s2, %s490_s28 }
  0x18   : > { %vm225_vm0 = vcmask 27648   ;;  %v587_v0 = vmov 0.0  }
  0x19   : > { %226 = vst.msk [vmem:[#allocation2] sm:$0xf] %vm225_vm0, %v587_v0 }
  0x1a PF: > { %p492_p11 = scmp.ge.s32.totalorder %s569_s11, 1 }
  0x1c   : > { %230 = sbr.rel (%p492_p11) target bundleno = 245 (0xf5), region = 36 }
  0x21   : > { %v231_v1 = vld [vmem:[%s647_s26] sm:$0xff]  ;;  %vm279_vm1 = vcmask 27648  }
  0x22   : > { %v233_v2 = vcombine.high %v231_v1, %v231_v1  ;;  %v235_v3 = vpack.c.bf16 %v231_v1, %v231_v1  ;;  %v237_v5 = vld [vmem:[#allocation2] sm:$0xf] }
  0x24   : > { %v236_v4 = vpack.c.bf16 %v233_v2, %v233_v2 }
  0x26   : > { %252 = vmatprep.subr.bf16.mxu0 %v236_v4  ;;  %270 = vmatprep.mubr.bf16.mxu0 %v236_v4 }
  0x27   : > { %253 = vmatpush1.bf16.xpose.msra.mxu0 %v235_v3 }
  0x2e   : > { %271 = vmatmul.mubr.bf16.vlgmr.msra.gmra.mxu0 %v235_v3 }
  0xee   : > { %v272_v6 = vpop.f32.mrf.mxu0 }
  0xef   : > { %v278_v7 = vadd.f32 %v272_v6, %v237_v5 }
  0xf0   : > { %v274_v8 = vpop.f32.mrf.mxu0 }
  0xf1   : > { %280 = vst.msk [vmem:[#allocation2] sm:$0xf] %vm279_vm1, %v278_v7 }
  0xf2   : > { %v275_v9 = vpop.f32.mrf.mxu0 }
  0xf4   : > { %v276_v10 = vpop.f32.mrf.mxu0 }
  0xf5 PF: > { %p493_p12 = scmp.ne.s32.totalorder %s569_s11, 1 }
  0xf7   : > { %284 = sbr.rel (%p493_p12) target bundleno = 568 (0x238), region = 40 }
  0xfc   : > { %v285_v11 = vld [vmem:[#allocation2] sm:$0xf]  ;;  %vm286_vm2 = vcmask 27648   ;;  %vm299_vm3 = vcmask 25600  }
  0xfd   : > { %v287_v12 = vsel %vm286_vm2, %v285_v11, inf }
  0xfe   : > { %288 = vmin.xlane.f32.xlu0 %v287_v12 }
 0x187   : > { %v289_v13 = vpop.xlane.xlu0 %288 }
 0x188   : > { %v290_v14 = vsub.f32 %v289_v13, %v285_v11 }
 0x18a   : > { %v291_v15 = vmul.f32 1.442695, %v290_v14 }
 0x18c   : > { %542 = vpow2.f32 %v291_v15 }
 0x199   : > { %v543_v16 = vpop.eup %542 }
 0x19a   : > { %v293_v17 = vsel %vm286_vm2, %v543_v16, 0.0 }
 0x19b   : > { %294 = vadd.xlane.f32.xlu0 %v293_v17 }
 0x224   : > { %v295_v18 = vpop.xlane.xlu0 %294 }
 0x225   : > { %544 = vrcp.f32 %v295_v18 }
 0x232   : > { %v545_v19 = vpop.eup %544 }
 0x233   : > { %v297_v20 = vmul.f32 %v545_v19, %v543_v16 }
 0x235   : > { %v298_v21 = vpack.c.bf16 %v297_v20, %v297_v20 }
 0x237   : > { %300 = vst.msk [vmem:[#allocation3] sm:$0x3] %vm299_vm3, %v298_v21 }
 0x238 PF: > { %304 = sbr.rel (%p188_p5) target bundleno = 784 (0x310), region = 44  ;;  %s364_s4 = sld [smem:[#allocation4]] (!%p188_p5) }
 0x23d   : > { %v305_v22 = vld [vmem:[%s647_s26] sm:$0xff]  ;;  %vm316_vm4 = vcmask 1041408   ;;  %v588_v25 = vmov 0   ;;  %vm312_vm5 = vcmask 31744  }
 0x23e   : > { %v308_v23 = vcombine.high %v305_v22, %v305_v22  ;;  %v310_v24 = vpack.c.bf16 %v305_v22, %v305_v22  ;;  %355 = vmatprep.mubr.bf16.mxu0 %v588_v25  ;;  %v306_v28 = vld [vmem:[#allocation3] sm:$0x3]  ;;  %v365_v29 = vstv %s364_s4 }
 0x240   : > { %v311_v26 = vpack.c.bf16 %v308_v23, %v308_v23  ;;  %v318_v27 = vsel %vm316_vm4, %v310_v24, 0 }
 0x242   : > { %495 = vmatprep.subr.msk.bf16.mxu0 %vm316_vm4, %v311_v26 }
 0x243   : > { %338 = vmatpush1.bf16.msra.mxu0 %v318_v27 }
 0x246   : > { %496 = vmatmul.mubr.msk.bf16.vlgmr.msra.gmra.mxu0 %vm312_vm5, %v306_v28 }
 0x306   : > { %v357_v30 = vpop.f32.mrf.mxu0 }
 0x307   : > { %v366_v31 = vmul.f32 %v365_v29, %v357_v30 }
 0x308   : > { %v359_v32 = vpop.f32.mrf.mxu0 }
 0x309   : > { %v367_v33 = vmul.f32 %v365_v29, %v359_v32  ;;  %v368_v35 = vadd.f32 %v366_v31, %v305_v22 }
 0x30a   : > { %v361_v34 = vpop.f32.mrf.mxu0 }
 0x30b   : > { %v369_v36 = vadd.f32 %v367_v33, %v308_v23 }
 0x30c   : > { %v362_v37 = vpop.f32.mrf.mxu0 }
 0x30d   : > { %v372_v38 = vcombine.low %v368_v35, %v369_v36 }
 0x30f   : > { %374 = vst [vmem:[%s652_s3] sm:$0xff] %v372_v38 }
 0x310 PF: > { %s13_s15 = sadd.s32 1, %s585_s15   ;;  %s680_s11 = smov %s577_s13 }
 0x311   : > { %p10_p13 = scmp.ge.s32.totalorder %s13_s15, 6   ;;  %s681_s12 = smov %s581_s14 }
 0x312   : > { %s682_s13 = smov %s685_s0  ;;  %s683_s14 = smov %s689_s16 }
 0x313   :  { %12 = sbr.rel (!%p10_p13) target bundleno = 3 (0x3), region = 74 }

</bundles_post_ra>
